<compile_context>
chip_gen: v5e
topology: v5e:2x2
jax: 0.10.0
libtpu: 0.0.40
codegen_flags: <defaults>
</compile_context>

<pallas_src>
import functools

import jax
import jax.numpy as jnp
from jax.experimental import pallas as pl
from jax.experimental.pallas import tpu as pltpu

_LANE = 128
_VMEM_TILE_BUDGET = 12 * 1024 * 1024   # bytes across double-buffered in/out tiles per step
_VMEM_LIMIT = 32 * 1024 * 1024         # >= scoped default on v6e/v7x, raises v5e's 16 MiB


def _ceil_to(x: int, m: int) -> int:
    return ((x + m - 1) // m) * m


def _make_kernel(dist_type: str, with_dist: bool, use_mxu: bool):
    """cost = weight * norm(vec_weight * disp, axis=-1); vec_weight folded into the reducer."""
    if dist_type not in ("l2", "squared_l2", "l1"):
        raise NotImplementedError(f"dist_type={dist_type}")

    def _reduce(x_ref, red_ref):
        # x_ref:   (T, K) displacement tile in its native dtype
        #          (K = 128 on the packed path, K = D on the fallback path).
        # red_ref: f32 reducer. MXU path: (K, P) block-diagonal carrying vec_weight**2
        #          (or |vec_weight| for l1). Fallback: (1, K) weight row.
        x = x_ref[...]
        y = jnp.abs(x) if dist_type == "l1" else x * x     # VPU; stays bf16 on bf16 inputs
        y = y.astype(jnp.float32)
        if use_mxu:
            # Weighted, segmented reduction over D on the otherwise-idle MXU.
            z = jnp.dot(y, red_ref[...], preferred_element_type=jnp.float32)   # (T, P)
        else:
            z = jnp.sum(y * red_ref[...], axis=-1, keepdims=True)              # (T, 1)
        return jnp.sqrt(z) if dist_type == "l2" else z

    if with_dist:
        def kernel(w_ref, x_ref, red_ref, cost_ref, dist_ref):
            d = _reduce(x_ref, red_ref)
            dist_ref[...] = d
            # GaussianProjection(gaussian_params={}) is the identity -> t1 == dist.
            cost_ref[...] = w_ref[0] * d
    else:
        def kernel(w_ref, x_ref, red_ref, cost_ref):
            d = _reduce(x_ref, red_ref)
            cost_ref[...] = w_ref[0] * d

    return kernel


@functools.partial(jax.jit,
                   static_argnames=("dist_type", "return_goal_dist", "rows_per_step"))
def dist_cost(disp_vec, weight, vec_weight=None, dist_type="l2",
              return_goal_dist=False, rows_per_step=None):
    """JAX/Pallas equivalent of DistCost.forward.

    disp_vec:   [B, H, D] (any float dtype)
    weight:     scalar (module's self.weight)
    vec_weight: scalar / (D,) / (1, D) or None (module's self.vec_weight)
    returns cost f32[B, H] (and dist f32[B, H] if return_goal_dist).
    """
    B, H, D = disp_vec.shape
    M = B * H
    n_out = 2 if return_goal_dist else 1

    if vec_weight is None:
        vw = jnp.ones((D,), jnp.float32)
    else:
        vw = jnp.broadcast_to(jnp.squeeze(jnp.asarray(vec_weight, jnp.float32)), (D,))
    vw_pow = jnp.abs(vw) if dist_type == "l1" else vw * vw
    w = jnp.reshape(jnp.asarray(weight, jnp.float32), (1,))

    # Fast path: pack P = 128/D rows per 128-lane row and reduce over D on the MXU with a
    # block-diagonal reducer.  Fallback: unpacked (M, D) view + weighted lane-sum.
    P = (_LANE // D) if (D <= _LANE and _LANE % D == 0) else 0
    use_mxu = P >= 1 and (M % P == 0)
    if use_mxu:
        view = disp_vec.reshape(M // P, P * D)                       # metadata-only reshape
        red = jnp.einsum("pq,d->pdq",
                         jnp.eye(P, dtype=jnp.float32), vw_pow).reshape(P * D, P)
        out_last = P
    else:
        # TODO(synk): partial packing (largest divisor of M <= 128//D) is also zero-copy
        # for ragged M; kept on the simple path here for shape robustness.
        view = disp_vec.reshape(M, D)
        red = vw_pow.reshape(1, D)
        out_last = 1
    view_rows, view_cols = view.shape

    # Rows per grid step from the VMEM budget (double-buffered input + lane-padded outputs).
    itemsize = jnp.dtype(view.dtype).itemsize
    lanes_padded = _ceil_to(view_cols, _LANE)
    bytes_per_row = 2 * lanes_padded * itemsize + 2 * n_out * _LANE * 4
    T = max(8, (_VMEM_TILE_BUDGET // bytes_per_row) // 8 * 8)
    if rows_per_step is not None:                    # test / tuning hook
        T = max(8, _ceil_to(int(rows_per_step), 8))
    T = min(T, _ceil_to(view_rows, 8))
    G = pl.cdiv(view_rows, T)
    if G > 1 and G % 2 == 1:                         # keep both v7x TensorCores busy
        T = max(8, _ceil_to(pl.cdiv(view_rows, G + 1), 8))
        G = pl.cdiv(view_rows, T)

    out_sds = jax.ShapeDtypeStruct((view_rows, out_last), jnp.float32)
    out_spec = pl.BlockSpec((T, out_last), lambda i: (i, 0))
    out_shape = (out_sds, out_sds) if return_goal_dist else out_sds
    out_specs = (out_spec, out_spec) if return_goal_dist else out_spec

    outs = pl.pallas_call(
        _make_kernel(dist_type, return_goal_dist, use_mxu),
        out_shape=out_shape,
        grid=(G,),
        in_specs=[
            pl.BlockSpec(memory_space=pltpu.MemorySpace.SMEM),       # weight scalar (1,)
            pl.BlockSpec((T, view_cols), lambda i: (i, 0)),          # displacement rows
            pl.BlockSpec(red.shape, lambda i: (0, 0)),               # reducer (shared)
        ],
        out_specs=out_specs,
        compiler_params=pltpu.CompilerParams(
            dimension_semantics=("parallel",),
            vmem_limit_bytes=_VMEM_LIMIT,
        ),
    )(w, view, red)

    def unpack(y):
        return y.reshape(B, H)

    if return_goal_dist:
        return unpack(outs[0]), unpack(outs[1])
    return unpack(outs)


def _reference(disp_vec, weight, vec_weight, dist_type="l2"):
    x = jnp.asarray(vec_weight, jnp.float32).reshape(-1) * disp_vec.astype(jnp.float32)
    if dist_type == "l2":
        d = jnp.linalg.norm(x, ord=2, axis=-1)
    elif dist_type == "squared_l2":
        d = jnp.sum(jnp.square(x), axis=-1)
    elif dist_type == "l1":
        d = jnp.sum(jnp.abs(x), axis=-1)
    else:
        raise NotImplementedError
    return weight * d, d


if __name__ == "__main__":
    key = jax.random.PRNGKey(0)
    ok = True
    # (B, H, D, rows_per_step): packed MXU path (D | 128), multi-step grid with a partial
    # last block, and the unpacked fallback (ragged M / D not dividing 128).
    cases = (
        (2, 8, 32, None),     # packed path, single block
        (2, 600, 32, 128),    # packed path, multi-step grid + partial last block
        (5, 51, 32, None),    # M = 255 not divisible by 128//D -> unpacked fallback
        (3, 97, 7, 64),       # D = 7 (robot DOF) -> unpacked fallback, multi-step grid
    )
    for (B, H, D, rps) in cases:
        key, k1, k2 = jax.random.split(key, 3)
        disp_vec = jax.random.normal(k1, (B, H, D), dtype=jnp.float32)
        weight = jnp.float32(5.0)                                            # self.weight
        vec_weight = 0.5 + jax.random.uniform(k2, (D,), dtype=jnp.float32)   # self.vec_weight

        for dt in ("l2", "squared_l2", "l1"):
            cost, dist = dist_cost(disp_vec, weight, vec_weight, dist_type=dt,
                                   return_goal_dist=True, rows_per_step=rps)
            cost = jax.block_until_ready(cost)
            dist = jax.block_until_ready(dist)
            ref_cost, ref_dist = _reference(disp_vec, weight, vec_weight, dist_type=dt)
            # Tolerance is loose enough to cover a bf16-pass MXU f32 matmul should the
            # backend default to it; observed error is typically < 1e-6.
            ok &= bool(jnp.allclose(cost, ref_cost, rtol=1e-2, atol=1e-2))
            ok &= bool(jnp.allclose(dist, ref_dist, rtol=1e-2, atol=1e-2))

            cost_only = jax.block_until_ready(
                dist_cost(disp_vec, weight, vec_weight, dist_type=dt, rows_per_step=rps))
            ok &= bool(jnp.allclose(cost_only, ref_cost, rtol=1e-2, atol=1e-2))

    if ok:
        print("KERNEL_OK")
    else:
        raise SystemExit("mismatch vs reference")
</pallas_src>

<mosaic_0001>
module attributes {stable_mosaic.version = 11 : i64} {
  func.func @kernel(%arg0: i32, %arg1: memref<1xf32, #tpu.memory_space<smem>>, %arg2: memref<8x128xf32, #tpu.memory_space<vmem>>, %arg3: memref<128x4xf32, #tpu.memory_space<vmem>>, %arg4: memref<8x4xf32, #tpu.memory_space<vmem>>, %arg5: memref<8x4xf32, #tpu.memory_space<vmem>>) attributes {dimension_semantics = [#tpu.dimension_semantics<parallel>], iteration_bounds = array<i64: 1>, scalar_prefetch = 0 : i64, scratch_operands = 0 : i64, tpu.core_type = #tpu.core_type<tc>, window_params = [{transform_indices = @transform_0, window_bounds = array<i64: 1>}, {transform_indices = @transform_1, window_bounds = array<i64: 8, 128>}, {pipeline_mode = #tpu.pipeline_mode<synchronous>, transform_indices = @transform_2, window_bounds = array<i64: 128, 4>}, {transform_indices = @transform_3, window_bounds = array<i64: 8, 4>}, {transform_indices = @transform_4, window_bounds = array<i64: 8, 4>}]} {
    %c0 = arith.constant 0 : index
    %c0_0 = arith.constant 0 : index
    %0 = vector.load %arg2[%c0, %c0_0] : memref<8x128xf32, #tpu.memory_space<vmem>>, vector<8x128xf32>
    %1 = arith.mulf %0, %0 : vector<8x128xf32>
    %c0_1 = arith.constant 0 : index
    %c0_2 = arith.constant 0 : index
    %2 = vector.load %arg3[%c0_1, %c0_2] : memref<128x4xf32, #tpu.memory_space<vmem>>, vector<128x4xf32>
    %cst = arith.constant dense<0.000000e+00> : vector<8x4xf32>
    %3 = tpu.matmul %1, %2, %cst {dimension_numbers = #tpu.dot_dimension_numbers<[1], [0], [0], [1], [0, 0, 1, 1], [], []>} : vector<8x128xf32>, vector<128x4xf32>, vector<8x4xf32> -> vector<8x4xf32>
    %4 = math.sqrt %3 : vector<8x4xf32>
    %c0_3 = arith.constant 0 : index
    %c0_4 = arith.constant 0 : index
    %5 = vector.load %arg5[%c0_3, %c0_4] : memref<8x4xf32, #tpu.memory_space<vmem>>, vector<8x4xf32>
    tpu.vector_store %arg5[%c0_3, %c0_4], %4 {strides = array<i32>} : memref<8x4xf32, #tpu.memory_space<vmem>>, vector<8x4xf32>,
    %c0_5 = arith.constant 0 : index
    %6 = memref.load %arg1[%c0_5] : memref<1xf32, #tpu.memory_space<smem>>
    %7 = vector.broadcast %6 : f32 to vector<8x4xf32>
    %8 = arith.mulf %7, %4 : vector<8x4xf32>
    %c0_6 = arith.constant 0 : index
    %c0_7 = arith.constant 0 : index
    %9 = vector.load %arg4[%c0_6, %c0_7] : memref<8x4xf32, #tpu.memory_space<vmem>>, vector<8x4xf32>
    tpu.vector_store %arg4[%c0_6, %c0_7], %8 {strides = array<i32>} : memref<8x4xf32, #tpu.memory_space<vmem>>, vector<8x4xf32>,
    return
  }
  func.func @transform_0(%arg0: i32) -> i32 {
    %c0_i32 = arith.constant 0 : i32
    %c0_i32_0 = arith.constant 0 : i32
    return %c0_i32 : i32
  }
  func.func @transform_1(%arg0: i32) -> (i32, i32) {
    %c0_i32 = arith.constant 0 : i32
    %c0_i32_0 = arith.constant 0 : i32
    return %arg0, %c0_i32 : i32, i32
  }
  func.func @transform_2(%arg0: i32) -> (i32, i32) {
    %c0_i32 = arith.constant 0 : i32
    %c0_i32_0 = arith.constant 0 : i32
    %c0_i32_1 = arith.constant 0 : i32
    return %c0_i32, %c0_i32_0 : i32, i32
  }
  func.func @transform_3(%arg0: i32) -> (i32, i32) {
    %c0_i32 = arith.constant 0 : i32
    %c0_i32_0 = arith.constant 0 : i32
    return %arg0, %c0_i32 : i32, i32
  }
  func.func @transform_4(%arg0: i32) -> (i32, i32) {
    %c0_i32 = arith.constant 0 : i32
    %c0_i32_0 = arith.constant 0 : i32
    return %arg0, %c0_i32 : i32, i32
  }
}

</mosaic_0001>

<bundles_post_ra>
// kernel: mul.1
= control target key start
LH: loop header
LB: loop body
LE: loop exit
PB: predicated region body
PF: predicated region fallthrough
CT: control target
= control target key end

     0   :  { %s34_s0 = inlined_call_operand.vmem [shape: f32[32], index: 0, kind: input, shape index: {}, may-alias: {0,1}]   ;;  %s35_s1 = inlined_call_operand.vmem [shape: f32[32], index: 1, kind: input, shape index: {}, may-alias: {0,1}]   ;;  %s36_s2 = inlined_call_operand.vmem [shape: f32[32], index: 2, kind: output, shape index: {}]  }
   0x1   :  { %v3_v0 = vld [vmem:[%s34_s0] sm:$0x1] }
   0x2   :  { %v4_v1 = vld [vmem:[%s35_s1] sm:$0x1] }
   0x3   :  { %v7_v2 = vmul.f32 %v4_v1, %v3_v0 }
   0x5   :  { %9 = vst [vmem:[%s36_s2] sm:$0x1] %v7_v2 }

// kernel: dist_cost.1
= control target key start
LH: loop header
LB: loop body
LE: loop exit
PB: predicated region body
PF: predicated region fallthrough
CT: control target
= control target key end

     0   :  { %vm67_vm1 = vcmask 31744   ;;  %s242_s0 = inlined_call_operand.<no memory space> [shape: f32[1], index: 0, kind: input, shape index: {}]   ;;  %s243_s1 = inlined_call_operand.vmem [shape: f32[4,128], index: 1, kind: input, shape index: {}]   ;;  %s244_s2 = inlined_call_operand.vmem [shape: f32[128,4], index: 2, kind: input, shape index: {}]   ;;  %s245_s3 = inlined_call_operand.vmem [shape: f32[4,4], index: 3, kind: output, shape index: {0}]   ;;  %s246_s4 = inlined_call_operand.vmem [shape: f32[4,4], index: 4, kind: output, shape index: {1}]  }
   0x1   :  { %v34_v0 = vld [vmem:[%s244_s2 + $0x78] sm:$0xff]  ;;  %v33_v1 = vld [vmem:[%s244_s2 + $0x70] sm:$0xff]  ;;  %v32_v2 = vld [vmem:[%s244_s2 + $0x68] sm:$0xff]  ;;  %v70_v27 = vstv %s242_s0 }
   0x2   :  { %35 = vmatpush.msra.mxu0 %v34_v0  ;;  %v31_v3 = vld [vmem:[%s244_s2 + $0x60] sm:$0xff]  ;;  %v30_v4 = vld [vmem:[%s244_s2 + $0x58] sm:$0xff]  ;;  %v29_v5 = vld [vmem:[%s244_s2 + $0x50] sm:$0xff] }
   0x3   :  { %v28_v6 = vld [vmem:[%s244_s2 + $0x48] sm:$0xff]  ;;  %v27_v7 = vld [vmem:[%s244_s2 + $0x40] sm:$0xff]  ;;  %v26_v8 = vld [vmem:[%s244_s2 + $0x38] sm:$0xff] }
   0x4   :  { %36 = vmatpush.msra.mxu0 %v33_v1  ;;  %v25_v9 = vld [vmem:[%s244_s2 + $0x30] sm:$0xff]  ;;  %v24_v10 = vld [vmem:[%s244_s2 + $0x28] sm:$0xff]  ;;  %v23_v11 = vld [vmem:[%s244_s2 + $0x20] sm:$0xff] }
   0x5   :  { %v22_v12 = vld [vmem:[%s244_s2 + $0x18] sm:$0xff]  ;;  %v21_v13 = vld [vmem:[%s244_s2 + $0x10] sm:$0xff]  ;;  %v17_v14 = vld [vmem:[%s243_s1] sm:$0xff] }
   0x6   :  { %37 = vmatpush.msra.mxu0 %v32_v2  ;;  %v20_v15 = vld [vmem:[%s244_s2 + $0x8] sm:$0xff]  ;;  %v19_v16 = vld [vmem:[%s244_s2] sm:$0xff]  ;;  %v18_v17 = vmul.f32 %v17_v14, %v17_v14 }
   0x8   :  { %38 = vmatpush.msra.mxu0 %v31_v3 }
   0xa   :  { %39 = vmatpush.msra.mxu0 %v30_v4 }
   0xc   :  { %40 = vmatpush.msra.mxu0 %v29_v5 }
   0xe   :  { %41 = vmatpush.msra.mxu0 %v28_v6 }
  0x10   :  { %42 = vmatpush.msra.mxu0 %v27_v7 }
  0x12   :  { %43 = vmatpush.msra.mxu0 %v26_v8 }
  0x14   :  { %44 = vmatpush.msra.mxu0 %v25_v9 }
  0x16   :  { %45 = vmatpush.msra.mxu0 %v24_v10 }
  0x18   :  { %46 = vmatpush.msra.mxu0 %v23_v11 }
  0x1a   :  { %47 = vmatpush.msra.mxu0 %v22_v12 }
  0x1c   :  { %48 = vmatpush.msra.mxu0 %v21_v13 }
  0x1e   :  { %49 = vmatpush.msra.mxu0 %v20_v15 }
  0x20   :  { %50 = vmatpush.msra.mxu0 %v19_v16 }
  0x21   :  { %51 = vmatmul.f32.vlgmr.msra.gmra.mxu0 %v18_v17 }
  0x9e   :  { %v52_v18 = vpop.f32.mrf.mxu0 }
  0x9f   :  { %155 = vrsqrt.f32 %v52_v18  ;;  %vm62_vm0 = vcmp.eq.f32.partialorder %v52_v18, inf  ;;  %v65_v26 = vand.u32 2147483648, %v52_v18  ;;  %vm64_vm2 = vcmp.eq.f32.partialorder %v52_v18, 0.0 }
  0xa5   :  { %v156_v19 = vpop.eup %155 }
  0xa6   :  { %v56_v20 = vmul.f32 %v156_v19, %v52_v18 }
  0xa8   :  { %v57_v21 = vmul.f32 %v156_v19, %v56_v20 }
  0xaa   :  { %v58_v22 = vmul.f32 0.5, %v57_v21 }
  0xac   :  { %v59_v23 = vsub.f32 1.5, %v58_v22 }
  0xae   :  { %v60_v24 = vmul.f32 %v156_v19, %v59_v23 }
  0xb0   :  { %v61_v25 = vmul.f32 %v60_v24, %v52_v18 }
  0xb2   :  { %v63_v28 = vsel %vm62_vm0, %v52_v18, %v61_v25 }
  0xb3   :  { %v66_v29 = vsel %vm64_vm2, %v65_v26, %v63_v28 }
  0xb4   :  { %68 = vst.msk [vmem:[#allocation4] sm:$0xff] %vm67_vm1, %v66_v29  ;;  %v71_v30 = vmul.f32 %v70_v27, %v66_v29 }
  0xb6   :  { %72 = vst.msk [vmem:[#allocation3] sm:$0xff] %vm67_vm1, %v71_v30 }
  0xbb   :  { %v126_v31 = vld [vmem:[#allocation4] sm:$0xf] }
  0xbc   :  { %127 = vst [vmem:[%s246_s4] sm:$0xf] %v126_v31 }
  0xbd   :  { %v91_v32 = vld [vmem:[#allocation3] sm:$0xf] }
  0xbe   :  { %92 = vst [vmem:[%s245_s3] sm:$0xf] %v91_v32 }

</bundles_post_ra>
